<compile_context>
chip_gen: v6e
topology: v6e:2x2x1
jax: 0.10.0
libtpu: 0.0.40
codegen_flags: <defaults>
</compile_context>

<pallas_src>
import functools

import jax
import jax.numpy as jnp
from jax.experimental import pallas as pl
from jax.experimental.pallas import tpu as pltpu


def _cov_partial_kernel(p_ref, t_ref, out_ref, *, stride, num_rows, tile_rows,
                        need_row_mask):
    """Per-row-tile partial sums.  out tile: col 0 = shrink sum, col 1 = diff sum."""
    p = p_ref[...].astype(jnp.float32)
    t = t_ref[...].astype(jnp.float32)
    e = p - t                       # single error pass, reused by both losses

    if need_row_mask:               # static flag: only emitted when B % tile_rows != 0
        row = (jax.lax.broadcasted_iota(jnp.int32, e.shape, 0)
               + pl.program_id(0) * tile_rows)
        e = jnp.where(row < num_rows, e, jnp.float32(0.0))   # kill stale tail rows

    # ShrinkageLoss (mode='pretrain'):
    #   l*l / (1 + exp(0.2*(1-l))) == l*l * sigmoid(0.2*(l-1))
    #                              == l*l * (0.5 + 0.5*tanh(0.1*(l-1)))
    # tanh goes to the EUP slot; no f32 divide needed.
    # TODO(synk): mode='prediction' (l = |e| / targets) is not implemented.
    l = jnp.abs(e)
    shrink = (l * l) * (jnp.float32(0.5) + jnp.float32(0.5)
                        * jnp.tanh(jnp.float32(0.1) * (l - jnp.float32(1.0))))
    shrink_sum = jnp.sum(shrink)    # masked rows contribute exactly 0

    # diff along the original length axis == stride-C difference on the fused
    # (length, channel) lane axis.  No lane padding -> every column of d is a
    # valid diff, so no mask is needed.
    if e.shape[1] > stride:
        d = e[:, stride:] - e[:, :-stride]
        diff_sum = jnp.sum(d * d)
    else:                           # L == 1: torch.diff is empty
        diff_sum = jnp.float32(0.0)

    # Emit the two partial sums as one lane-aligned (8,128) f32 tile (4 KiB per
    # grid step -> negligible HBM write traffic).  Per-block outputs keep the
    # grid axis "parallel" (both v7x TensorCores stream rows) with no shared
    # accumulator to race on; the tiny final reduce happens in the wrapper.
    lane = jax.lax.broadcasted_iota(jnp.int32, (8, 128), 1)
    out_ref[...] = jnp.where(lane == 0, shrink_sum,
                             jnp.where(lane == 1, diff_sum, jnp.float32(0.0)))


def cov_weighting_loss(predicts, targets):
    """mode='pretrain'.  Returns (shrink_loss, diff_loss) as f32 scalars."""
    assert predicts.shape == targets.shape and predicts.ndim == 3
    B, L, C = predicts.shape
    F = L * C

    # Contiguous (free) reshape; NO padding.  A full-extent last block dim is
    # exempt from the 128-lane rule, so the true F is used directly and DMA
    # reads exactly the real data.
    p2 = predicts.reshape(B, F)
    t2 = targets.reshape(B, F)

    # Row tile: <= ~4 MiB f32 per input tile.  2 inputs x 2 pipeline buffers
    # (16 MiB) + f32 intermediates fit comfortably under the explicit 48 MiB
    # scoped-VMEM limit below on v5e/v6e/v7x (v7x: 64 MiB physical).
    rows_budget = max(8, ((4 << 20) // (F * 4)) // 8 * 8)
    tr = B if B <= rows_budget else rows_budget
    grid = pl.cdiv(B, tr)
    need_row_mask = (B % tr) != 0   # partial last block -> mask stale rows in-kernel

    kernel = functools.partial(
        _cov_partial_kernel,
        stride=C,
        num_rows=B,
        tile_rows=tr,
        need_row_mask=need_row_mask,
    )

    partials = pl.pallas_call(
        kernel,
        out_shape=jax.ShapeDtypeStruct((grid, 8, 128), jnp.float32),
        grid=(grid,),
        in_specs=[
            pl.BlockSpec((tr, F), lambda i: (i, 0)),
            pl.BlockSpec((tr, F), lambda i: (i, 0)),
        ],
        out_specs=pl.BlockSpec((None, 8, 128), lambda i: (i, 0, 0)),
        compiler_params=pltpu.CompilerParams(
            dimension_semantics=("parallel",),      # megacore-shardable on v7x
            vmem_limit_bytes=48 * 1024 * 1024,
        ),
    )(p2, t2)

    # Tiny final reduction + normalization by the true element counts.
    shrink_sum = jnp.sum(partials[:, 0, 0])
    diff_sum = jnp.sum(partials[:, 0, 1])
    shrink_loss = shrink_sum / jnp.float32(B * L * C)
    # torch.diff along dim=1 has (L-1)*C elements per batch row; L == 1 gives
    # 0/0 = NaN, matching torch's mean over an empty tensor.
    diff_loss = diff_sum / jnp.float32(B * (L - 1) * C)
    return shrink_loss, diff_loss


def _reference(predicts, targets):
    # pure-JAX reference (matches the PyTorch forward) for a sanity check
    p = predicts.astype(jnp.float32)
    t = targets.astype(jnp.float32)
    l = jnp.abs(p - t)
    shrink = jnp.mean(l * l / (1.0 + jnp.exp(0.2 * (1.0 - l))))
    dp = jnp.diff(p, axis=1)
    dt = jnp.diff(t, axis=1)
    diff = jnp.mean((dp - dt) ** 2)
    return shrink, diff


if __name__ == "__main__":
    key = jax.random.PRNGKey(0)
    k1, k2 = jax.random.split(key)
    batch, length, chans = 2, 8, 2   # velocities of shape (batch, length, 2)
    predicts = jax.random.normal(k1, (batch, length, chans), dtype=jnp.float32)
    targets = jax.random.normal(k2, (batch, length, chans), dtype=jnp.float32)

    shrink_loss, diff_loss = cov_weighting_loss(predicts, targets)
    jax.block_until_ready((shrink_loss, diff_loss))

    ref_shrink, ref_diff = _reference(predicts, targets)
    assert jnp.allclose(shrink_loss, ref_shrink, rtol=1e-5, atol=1e-5), (shrink_loss, ref_shrink)
    assert jnp.allclose(diff_loss, ref_diff, rtol=1e-5, atol=1e-5), (diff_loss, ref_diff)

    print("KERNEL_OK")
</pallas_src>

<mosaic_0001>
module attributes {stable_mosaic.version = 11 : i64} {
  func.func @_cov_partial_kernel(%arg0: i32, %arg1: memref<2x16xf32, #tpu.memory_space<vmem>>, %arg2: memref<2x16xf32, #tpu.memory_space<vmem>>, %arg3: memref<1x8x128xf32, #tpu.memory_space<vmem>>) attributes {dimension_semantics = [#tpu.dimension_semantics<parallel>], iteration_bounds = array<i64: 1>, scalar_prefetch = 0 : i64, scratch_operands = 0 : i64, tpu.core_type = #tpu.core_type<tc>, window_params = [{transform_indices = @transform_0, window_bounds = array<i64: 2, 16>}, {transform_indices = @transform_1, window_bounds = array<i64: 2, 16>}, {transform_indices = @transform_2, window_bounds = array<i64: 1, 8, 128>}]} {
    %c0 = arith.constant 0 : index
    %c0_0 = arith.constant 0 : index
    %0 = vector.load %arg1[%c0, %c0_0] : memref<2x16xf32, #tpu.memory_space<vmem>>, vector<2x16xf32>
    %c0_1 = arith.constant 0 : index
    %c0_2 = arith.constant 0 : index
    %1 = vector.load %arg2[%c0_1, %c0_2] : memref<2x16xf32, #tpu.memory_space<vmem>>, vector<2x16xf32>
    %2 = arith.subf %0, %1 : vector<2x16xf32>
    %3 = math.absf %2 : vector<2x16xf32>
    %4 = arith.mulf %3, %3 : vector<2x16xf32>
    %cst = arith.constant 1.000000e+00 : f32
    %5 = vector.broadcast %cst : f32 to vector<2x16xf32>
    %6 = arith.subf %3, %5 : vector<2x16xf32>
    %cst_3 = arith.constant 1.000000e-01 : f32
    %7 = vector.broadcast %cst_3 : f32 to vector<2x16xf32>
    %8 = arith.mulf %7, %6 : vector<2x16xf32>
    %9 = math.tanh %8 : vector<2x16xf32>
    %cst_4 = arith.constant 5.000000e-01 : f32
    %10 = vector.broadcast %cst_4 : f32 to vector<2x16xf32>
    %11 = arith.mulf %10, %9 : vector<2x16xf32>
    %cst_5 = arith.constant 5.000000e-01 : f32
    %12 = vector.broadcast %cst_5 : f32 to vector<2x16xf32>
    %13 = arith.addf %12, %11 : vector<2x16xf32>
    %14 = arith.mulf %4, %13 : vector<2x16xf32>
    %15 = vector.shape_cast %14 : vector<2x16xf32> to vector<1x2x16xf32>
    %cst_6 = arith.constant dense<0.000000e+00> : vector<1xf32>
    %16 = vector.multi_reduction <add>, %15, %cst_6 [1, 2] : vector<1x2x16xf32> to vector<1xf32>
    %17 = vector.shape_cast %16 : vector<1xf32> to vector<1x1x1xf32>
    %18 = vector.extract %17[0, 0, 0] : f32 from vector<1x1x1xf32>
    %19 = vector.extract_strided_slice %2 {offsets = [0, 2], sizes = [2, 14], strides = [1, 1]} : vector<2x16xf32> to vector<2x14xf32>
    %20 = vector.extract_strided_slice %2 {offsets = [0, 0], sizes = [2, 14], strides = [1, 1]} : vector<2x16xf32> to vector<2x14xf32>
    %21 = arith.subf %19, %20 : vector<2x14xf32>
    %22 = arith.mulf %21, %21 : vector<2x14xf32>
    %23 = vector.shape_cast %22 : vector<2x14xf32> to vector<1x2x14xf32>
    %cst_7 = arith.constant dense<0.000000e+00> : vector<1xf32>
    %24 = vector.multi_reduction <add>, %23, %cst_7 [1, 2] : vector<1x2x14xf32> to vector<1xf32>
    %25 = vector.shape_cast %24 : vector<1xf32> to vector<1x1x1xf32>
    %26 = vector.extract %25[0, 0, 0] : f32 from vector<1x1x1xf32>
    %27 = tpu.iota {dimensions = array<i32: 1>} : vector<8x128xi32>
    %c0_i32 = arith.constant 0 : i32
    %28 = vector.broadcast %c0_i32 : i32 to vector<8x128xi32>
    %29 = arith.cmpi eq, %27, %28 : vector<8x128xi32>
    %c1_i32 = arith.constant 1 : i32
    %30 = vector.broadcast %c1_i32 : i32 to vector<8x128xi32>
    %31 = arith.cmpi eq, %27, %30 : vector<8x128xi32>
    %cst_8 = arith.constant 0.000000e+00 : f32
    %32 = vector.broadcast %26 : f32 to vector<8x128xf32>
    %33 = vector.broadcast %cst_8 : f32 to vector<8x128xf32>
    %34 = arith.select %31, %32, %33 : vector<8x128xi1>, vector<8x128xf32>
    %35 = vector.broadcast %18 : f32 to vector<8x128xf32>
    %36 = arith.select %29, %35, %34 : vector<8x128xi1>, vector<8x128xf32>
    %c0_9 = arith.constant 0 : index
    %c0_10 = arith.constant 0 : index
    %c0_11 = arith.constant 0 : index
    %37 = vector.load %arg3[%c0_9, %c0_10, %c0_11] : memref<1x8x128xf32, #tpu.memory_space<vmem>>, vector<1x8x128xf32>
    %38 = vector.shape_cast %37 : vector<1x8x128xf32> to vector<8x128xf32>
    %39 = vector.shape_cast %36 : vector<8x128xf32> to vector<1x8x128xf32>
    tpu.vector_store %arg3[%c0_9, %c0_10, %c0_11], %39 {strides = array<i32>} : memref<1x8x128xf32, #tpu.memory_space<vmem>>, vector<1x8x128xf32>,
    return
  }
  func.func @transform_0(%arg0: i32) -> (i32, i32) {
    %c0_i32 = arith.constant 0 : i32
    %c0_i32_0 = arith.constant 0 : i32
    return %arg0, %c0_i32 : i32, i32
  }
  func.func @transform_1(%arg0: i32) -> (i32, i32) {
    %c0_i32 = arith.constant 0 : i32
    %c0_i32_0 = arith.constant 0 : i32
    return %arg0, %c0_i32 : i32, i32
  }
  func.func @transform_2(%arg0: i32) -> (i32, i32, i32) {
    %c0_i32 = arith.constant 0 : i32
    %c0_i32_0 = arith.constant 0 : i32
    %c0_i32_1 = arith.constant 0 : i32
    return %arg0, %c0_i32, %c0_i32_0 : i32, i32, i32
  }
}

</mosaic_0001>

<bundles_post_ra>
// kernel: tpu_custom_call.1
= control target key start
LH: loop header
LB: loop body
LE: loop exit
PB: predicated region body
PF: predicated region fallthrough
CT: control target
= control target key end

     0   :  { %7 = vsyncpa [#allocation3], 0  ;;  %s211_s0 = inlined_call_operand.hbm [shape: f32[2,16], index: 0, kind: input, shape index: {}]   ;;  %s212_s1 = inlined_call_operand.hbm [shape: f32[2,16], index: 1, kind: input, shape index: {}]   ;;  %s213_s2 = inlined_call_operand.hbm [shape: f32[1,8,128], index: 2, kind: output, shape index: {}]  }
   0x1   :  { %8 = vsyncpa [#allocation6], 0 }
   0x2   :  { %9 = vsyncpa [#allocation4], 0  ;;  %s182_s9 = smov [#allocation2]   ;;  %s183_s11 = smov [#allocation5]  }
   0x3   :  { %s16_s10 = sshll.u32 %s182_s9, 4  ;;  %s26_s12 = sshll.u32 %s183_s11, 4  ;;  %s17_s10 = int_to_ptr.vmem [resolvable:$true] %s16_s10  ;;  %s27_s12 = int_to_ptr.vmem [resolvable:$true] %s26_s12 }
   0x4   :  { %s124_s13 = scalar_lea.vmem %s17_s10, 32  ;;  %p129_p1 = scmp.lt.s32.totalorder %s17_s10, %s17_s10 }
   0x5   :  { %p125_p0 = scmp.ne.s32.totalorder %s17_s10, %s124_s13  ;;  %p130_p2 = scmp.lt.s32.totalorder %s124_s13, %s124_s13 }
   0x7   :  { %p131_p3 = por %p130_p2, %p129_p1 }
   0x9   :  { %p132_p4 = pnand %p131_p3, %p125_p0 }
   0xb   :  { %135 = shalt.err (!%p132_p4)
}
   0xc   :  { %19 = dma.hbm_to_vmem [thread:$0]  %s211_s0, 32, %s17_s10, [#allocation3]  }
   0xd   :  { %s144_s16 = scalar_lea.vmem %s27_s12, 32  ;;  %p149_p6 = scmp.lt.s32.totalorder %s27_s12, %s27_s12 }
   0xe   :  { %p145_p5 = scmp.ne.s32.totalorder %s27_s12, %s144_s16  ;;  %p150_p7 = scmp.lt.s32.totalorder %s144_s16, %s144_s16 }
  0x10   :  { %p151_p8 = por %p150_p7, %p149_p6 }
  0x12   :  { %p152_p9 = pnand %p151_p8, %p145_p5 }
  0x14   :  { %155 = shalt.err (!%p152_p9)
}
  0x15   :  { %29 = dma.hbm_to_vmem [thread:$0]  %s212_s1, 32, %s27_s12, [#allocation6]  }
  0x16   :  { %176 = dma.done.wait [#allocation3], 32  }
  0x17   :  { %177 = vsyncadd [#allocation3], 4294967264 }
  0x18   :  { %178 = dma.done.wait [#allocation6], 32  }
  0x19   :  { %179 = vsyncadd [#allocation6], 4294967264  ;;  %v36_v0 = vld [vmem:[#allocation2] sm:$0x3]  ;;  %v37_v1 = vld [vmem:[#allocation5] sm:$0x3]  ;;  %v79_v31 = vlaneseq }
  0x1a   :  { %v38_v2 = vsub.f32 %v36_v0, %v37_v1  ;;  %s184_s19 = smov 2   ;;  %vm47_vm0 = vcmask 123904   ;;  %s185_s0 = smov 126   ;;  %vm68_vm1 = vcmask 107520  }
  0x1b   :  { %v80_v32 = vand.u32 127, %v79_v31  ;;  %s186_s20 = smov [#allocation7]  }
  0x1c   :  { %59 = vrot.lane.b32.xlu0 %v38_v2, %s184_s19  ;;  %v39_v3 = vand.u32 2147483647, %v38_v2  ;;  %s94_s21 = sshll.u32 %s186_s20, 4  ;;  %s95_s21 = int_to_ptr.vmem [resolvable:$true] %s94_s21 }
  0x1d   :  { %vm82_vm2 = vcmp.eq.s32.totalorder %v80_v32, 1  ;;  %vm81_vm3 = vcmp.eq.s32.totalorder %v80_v32, 0  ;;  %s156_s23 = scalar_lea.vmem %s95_s21, 128  ;;  %p161_p11 = scmp.lt.s32.totalorder %s95_s21, %s95_s21 }
  0x1e   :  { %v104_v4 = vadd.f32 -1.0, %v39_v3  ;;  %v40_v7 = vmul.f32 %v39_v3, %v39_v3  ;;  %p157_p10 = scmp.ne.s32.totalorder %s95_s21, %s156_s23  ;;  %p162_p12 = scmp.lt.s32.totalorder %s156_s23, %s156_s23 }
  0x20   :  { %v42_v5 = vmul.f32 0.1, %v104_v4  ;;  %p163_p13 = por %p162_p12, %p161_p11 }
  0x22   :  { %114 = vtanh.f32 %v42_v5  ;;  %p164_p0 = pnand %p163_p13, %p157_p10 }
  0x2f   :  { %v115_v6 = vpop.eup %114 }
  0x30   :  { %v44_v8 = vmul.f32 0.5, %v115_v6 }
  0x32   :  { %v45_v9 = vadd.f32 0.5, %v44_v8 }
  0x34   :  { %v46_v10 = vmul.f32 %v45_v9, %v40_v7 }
  0x36   :  { %v48_v11 = vsel %vm47_vm0, %v46_v10, 0.0 }
  0x37   :  { %49 = vadd.xlane.f32.xlu1 %v48_v11 }
  0x8e   :  { %v60_v12 = vpop.permute.xlu0 %59 }
  0x8f   :  { %v62_v13 = vsub.f32 %v38_v2, %v60_v12 }
  0x91   :  { %v63_v14 = vmul.f32 %v62_v13, %v62_v13 }
  0x93   :  { %65 = vrot.lane.b32.xlu0 %v63_v14, %s185_s0 }
  0xc0   :  { %v50_v15 = vpop.xlane.xlu1 %49 }
  0xc1   :  { %v51_v16 = vrot.slane %v50_v15, 4 }
  0xc3   :  { %v52_v18 = vadd.f32 %v51_v16, %v50_v15 }
  0xc5   :  { %v53_v20 = vrot.slane %v52_v18, 2 }
  0xc7   :  { %v54_v21 = vadd.f32 %v53_v20, %v52_v18 }
  0xc9   :  { %v55_v22 = vrot.slane %v54_v21, 1 }
  0xcb   :  { %v56_v23 = vadd.f32 %v55_v22, %v54_v21 }
  0xcd   :  { %105 = vpush %v56_v23 }
  0xfe   :  { %s106_s1 = spop %105 }
  0xff   :  { %v85_v34 = vstv %s106_s1 }
 0x105   :  { %v66_v17 = vpop.permute.xlu0 %65 }
 0x106   :  { %v69_v19 = vsel %vm68_vm1, %v66_v17, 0.0 }
 0x107   :  { %70 = vadd.xlane.f32.xlu1 %v69_v19 }
 0x190   :  { %v71_v24 = vpop.xlane.xlu1 %70 }
 0x191   :  { %v72_v25 = vrot.slane %v71_v24, 4 }
 0x193   :  { %v73_v26 = vadd.f32 %v72_v25, %v71_v24 }
 0x195   :  { %v74_v27 = vrot.slane %v73_v26, 2 }
 0x197   :  { %v75_v28 = vadd.f32 %v74_v27, %v73_v26 }
 0x199   :  { %v76_v29 = vrot.slane %v75_v28, 1 }
 0x19b   :  { %v77_v30 = vadd.f32 %v76_v29, %v75_v28 }
 0x19d   :  { %107 = vpush %v77_v30 }
 0x1ce   :  { %s108_s22 = spop %107 }
 0x1cf   :  { %v83_v33 = vstv %s108_s22 }
 0x1d0   :  { %v84_v35 = vsel %vm82_vm2, %v83_v33, 0.0 }
 0x1d1   :  { %v86_v36 = vsel %vm81_vm3, %v85_v34, %v84_v35 }
 0x1d2   :  { %87 = vst [vmem:[#allocation7] sm:$0xff] %v86_v36 }
 0x1d3   :  { %167 = shalt.err (!%p164_p0)
}
 0x1d4   :  { %97 = dma.vmem_to_hbm [thread:$0]  %s95_s21, 128, %s213_s2, [#allocation4]  }
 0x1d5   :  { %180 = dma.done.wait [#allocation4], 128  }
 0x1d6   :  { %181 = vsyncadd [#allocation4], 4294967168 }
 0x1d7   :  { %101 = vsyncpa [#allocation3], 1 }
 0x1d8   :  { %102 = vsyncpa [#allocation6], 1 }
 0x1d9   :  { %103 = vsyncpa [#allocation4], 1 }

</bundles_post_ra>
